<compile_context>
chip_gen: v7x
topology: tpu7x:2x2x1
jax: 0.10.0
libtpu: 0.0.40
codegen_flags: <defaults>
</compile_context>

<pallas_src>
import jax
import jax.numpy as jnp
import numpy as np
from jax.experimental import pallas as pl
from jax.experimental.pallas import tpu as pltpu


def _round_up(n, m):
    return ((n + m - 1) // m) * m


def _make_kernel(W, lanes, cin_p, cout_p):
    # 9 static lane shifts for the 3x3 taps, (dy, dx) row-major; index 4 is the
    # center tap (no roll, no mask needed).
    shifts = [dy * W + dx for dy in (-1, 0, 1) for dx in (-1, 0, 1)]
    k1 = 9 * cin_p + 8          # im2col rows + 8 bias-fold (ones) rows

    def kernel(x_ref, m_ref, w1_ref, w2t_ref, b2_ref, o_ref, col_ref):
        # x_ref  : (cin_p, L)        folded input, pixels on lanes
        # m_ref  : (16, L)           host-precomputed boundary masks (rows 0..8)
        # w1_ref : (cmid, k1)        conv1 taps + bias column, K-flattened
        # w2t_ref: (9*cout_p, cmid)  conv2 taps, tap-major rows
        # b2_ref : (cout_p, 1)
        # o_ref  : (cout_p, L)       lane-dense output
        # col_ref: (k1, L)           VMEM scratch for the conv1 im2col
        x = x_ref[...]

        # ---- conv1 im2col: write each rolled+masked slab ONCE (no concat) ----
        for t, s in enumerate(shifts):
            if s == 0:
                col_ref[pl.ds(t * cin_p, cin_p), :] = x
            else:
                col_ref[pl.ds(t * cin_p, cin_p), :] = (
                    pltpu.roll(x, (-s) % lanes, 1) * m_ref[pl.ds(t, 1), :])
        # bias-fold rows: all ones (w1 columns past the bias column are zero)
        col_ref[pl.ds(9 * cin_p, 8), :] = jnp.ones((8, lanes), jnp.float32)

        # ---- conv1 + bias + ReLU: one (cmid, k1) @ (k1, L) MXU pass ----------
        h = jnp.dot(w1_ref[...], col_ref[...],
                    preferred_element_type=jnp.float32)
        h = jnp.maximum(h, 0.0)                              # (cmid, L)

        # ---- conv2, output-side: one (9*cout_p, cmid) @ (cmid, L) MXU pass ---
        # then roll/mask/accumulate the tiny (cout_p, L) per-tap outputs, so
        # the (9*cmid, L) im2col slab is never materialized.
        taps = jnp.dot(w2t_ref[...], h, preferred_element_type=jnp.float32)
        acc = taps[4 * cout_p:5 * cout_p, :]        # center tap: no roll/mask
        for t, s in enumerate(shifts):
            if s == 0:
                continue
            tap = taps[t * cout_p:(t + 1) * cout_p, :]
            acc = acc + (pltpu.roll(tap, (-s) % lanes, 1)
                         * m_ref[pl.ds(t, 1), :])
        o_ref[...] = (acc + b2_ref[...]).astype(o_ref.dtype)

    return kernel


def advanced_video_model(x_nchw, w1, b1, w2, b2, *, n_bands=1):
    """Pallas TPU implementation of AdvancedVideoModel.forward.

    x_nchw: (B, Cin, H, W) f32 ; w1: (Cmid, Cin, 3, 3), b1: (Cmid,)
    w2: (Cout, Cmid, 3, 3), b2: (Cout,)  ->  (B, Cout, H, W) f32
    n_bands: number of "parallel" bands of WHOLE images (halo-free).  1 = one
             grid step (best on v5e/v6e and at small sizes where per-step
             overhead dominates); use 2+ on v7x / large inputs to keep both
             TensorCores busy and bound per-step VMEM.
    """
    B, Cin, H, W = x_nchw.shape
    Cmid = w1.shape[0]
    Cout = w2.shape[0]
    HW = H * W
    Cin_p = _round_up(Cin, 8)
    Cout_p = _round_up(Cout, 8)
    K1 = 9 * Cin_p + 8

    assert B % n_bands == 0, "n_bands must divide the batch"
    if n_bands == 1:
        n_lanes = _round_up(B * HW, 128)     # keep rolls / stores lane-dense
    else:
        n_lanes = B * HW
        assert ((B // n_bands) * HW) % 128 == 0, (
            "per-band lane count must stay a multiple of 128")
    lanes_band = n_lanes // n_bands

    # Fold batch into the lane axis: (B,Cin,H,W) -> (Cin_p, n_lanes).
    x2 = jnp.transpose(x_nchw.reshape(B, Cin, HW), (1, 0, 2))
    x2 = x2.reshape(Cin, B * HW)
    x2 = jnp.pad(x2, ((0, Cin_p - Cin), (0, n_lanes - B * HW)))

    # Host-precomputed boundary masks: one row per 3x3 tap (padded 9 -> 16
    # sublanes); pad lanes are zero.  Per-image row/col validity also prevents
    # any cross-image bleed from the folded-batch lane rolls.
    pix = np.arange(B * HW) % HW
    row, col = pix // W, pix % W
    masks = np.zeros((16, n_lanes), np.float32)
    t = 0
    for dy in (-1, 0, 1):
        for dx in (-1, 0, 1):
            masks[t, :B * HW] = ((row + dy >= 0) & (row + dy < H) &
                                 (col + dx >= 0) & (col + dx < W)
                                 ).astype(np.float32)
            t += 1
    masks = jnp.asarray(masks)

    # conv1 weights OIHW -> (Cmid, 9*Cin_p), plus the bias folded in as one
    # extra K column (the remaining 7 pad columns are zero).
    w1k = jnp.pad(jnp.transpose(w1, (0, 2, 3, 1)),
                  ((0, 0), (0, 0), (0, 0), (0, Cin_p - Cin)))
    w1k = w1k.reshape(Cmid, 9 * Cin_p)
    w1k = jnp.concatenate(
        [w1k, b1.reshape(Cmid, 1), jnp.zeros((Cmid, 7), jnp.float32)], axis=1)

    # conv2 weights OIHW -> tap-major (9*Cout_p, Cmid) for the output-side form.
    w2t = jnp.transpose(w2, (2, 3, 0, 1)).reshape(9, Cout, Cmid)
    w2t = jnp.pad(w2t, ((0, 0), (0, Cout_p - Cout), (0, 0)))
    w2t = w2t.reshape(9 * Cout_p, Cmid)
    b2k = jnp.pad(b2, (0, Cout_p - Cout)).reshape(Cout_p, 1)

    # NOTE: matmul operands could be cast to bf16 (MXU-native) with f32
    # accumulation for ~3x fewer MXU passes, but that exceeds the 2e-4
    # validation tolerance used below, so f32 operands are kept.
    const = lambda b: (0, 0)   # weight / bias blocks are grid-invariant
    out = pl.pallas_call(
        _make_kernel(W, lanes_band, Cin_p, Cout_p),
        out_shape=jax.ShapeDtypeStruct((Cout_p, n_lanes), jnp.float32),
        grid_spec=pltpu.PrefetchScalarGridSpec(
            num_scalar_prefetch=0,
            grid=(n_bands,),
            in_specs=[
                pl.BlockSpec((Cin_p, lanes_band), lambda b: (0, b)),
                pl.BlockSpec((16, lanes_band), lambda b: (0, b)),
                pl.BlockSpec((Cmid, K1), const),
                pl.BlockSpec((9 * Cout_p, Cmid), const),
                pl.BlockSpec((Cout_p, 1), const),
            ],
            out_specs=pl.BlockSpec((Cout_p, lanes_band), lambda b: (0, b)),
            scratch_shapes=[pltpu.VMEM((K1, lanes_band), jnp.float32)],
        ),
        compiler_params=pltpu.CompilerParams(
            dimension_semantics=("parallel",)),
    )(x2, masks, w1k, w2t, b2k)

    # lane-dense (Cout_p, B*HW) -> NCHW (slice + reshape + batch transpose)
    out = out[:Cout, :B * HW].reshape(Cout, B, H, W)
    return jnp.transpose(out, (1, 0, 2, 3))


def _reference(x_nchw, w1, b1, w2, b2):
    """Pure-JAX reference matching PyTorch Conv2d semantics (NCHW / OIHW)."""
    dn = ("NCHW", "OIHW", "NCHW")
    h = jax.lax.conv_general_dilated(
        x_nchw, w1, window_strides=(1, 1), padding=((1, 1), (1, 1)),
        dimension_numbers=dn) + b1[None, :, None, None]
    h = jnp.maximum(h, 0.0)
    o = jax.lax.conv_general_dilated(
        h, w2, window_strides=(1, 1), padding=((1, 1), (1, 1)),
        dimension_numbers=dn) + b2[None, :, None, None]
    return o


if __name__ == "__main__":
    # AdvancedVideoModel(n_frames_input=5): Cin=5, Cmid=64, Cout=2
    B, Cin, H, W = 2, 5, 16, 16
    Cmid, Cout = 64, 2

    key = jax.random.PRNGKey(0)
    kx, kw1, kb1, kw2, kb2 = jax.random.split(key, 5)

    x = jax.random.normal(kx, (B, Cin, H, W), jnp.float32)
    # deterministic synthetic parameters (PyTorch OIHW layout)
    w1 = 0.1 * jax.random.normal(kw1, (Cmid, Cin, 3, 3), jnp.float32)
    b1 = 0.1 * jax.random.normal(kb1, (Cmid,), jnp.float32)
    w2 = 0.1 * jax.random.normal(kw2, (Cout, Cmid, 3, 3), jnp.float32)
    b2 = 0.1 * jax.random.normal(kb2, (Cout,), jnp.float32)

    out = advanced_video_model(x, w1, b1, w2, b2)
    out = jax.block_until_ready(out)

    ref = _reference(x, w1, b1, w2, b2)
    np.testing.assert_allclose(np.asarray(out), np.asarray(ref),
                               rtol=2e-4, atol=2e-4)
    assert out.shape == (B, Cout, H, W)
    print("KERNEL_OK")
</pallas_src>

<mosaic_0001>
module attributes {stable_mosaic.version = 11 : i64} {
  func.func @kernel(%arg0: i32, %arg1: memref<8x512xf32, #tpu.memory_space<vmem>>, %arg2: memref<16x512xf32, #tpu.memory_space<vmem>>, %arg3: memref<64x80xf32, #tpu.memory_space<vmem>>, %arg4: memref<72x64xf32, #tpu.memory_space<vmem>>, %arg5: memref<8x1xf32, #tpu.memory_space<vmem>>, %arg6: memref<8x512xf32, #tpu.memory_space<vmem>>, %arg7: memref<80x512xf32, #tpu.memory_space<vmem>>) attributes {dimension_semantics = [#tpu.dimension_semantics<parallel>], iteration_bounds = array<i64: 1>, scalar_prefetch = 0 : i64, scratch_operands = 1 : i64, tpu.core_type = #tpu.core_type<tc>, window_params = [{transform_indices = @transform_0, window_bounds = array<i64: 8, 512>}, {transform_indices = @transform_1, window_bounds = array<i64: 16, 512>}, {pipeline_mode = #tpu.pipeline_mode<synchronous>, transform_indices = @transform_2, window_bounds = array<i64: 64, 80>}, {pipeline_mode = #tpu.pipeline_mode<synchronous>, transform_indices = @transform_3, window_bounds = array<i64: 72, 64>}, {pipeline_mode = #tpu.pipeline_mode<synchronous>, transform_indices = @transform_4, window_bounds = array<i64: 8, 1>}, {transform_indices = @transform_5, window_bounds = array<i64: 8, 512>}]} {
    %c0 = arith.constant 0 : index
    %c0_0 = arith.constant 0 : index
    %0 = vector.load %arg1[%c0, %c0_0] : memref<8x512xf32, #tpu.memory_space<vmem>>, vector<8x512xf32>
    %c17_i32 = arith.constant 17 : i32
    %1 = tpu.dynamic_rotate %0 by %c17_i32 dim 1 : vector<8x512xf32>, i32 -> vector<8x512xf32>
    %c0_1 = arith.constant 0 : index
    %c0_2 = arith.constant 0 : index
    %2 = vector.load %arg2[%c0_1, %c0_2] : memref<16x512xf32, #tpu.memory_space<vmem>>, vector<1x512xf32>
    %3 = vector.broadcast %2 : vector<1x512xf32> to vector<8x512xf32>
    %4 = arith.mulf %1, %3 : vector<8x512xf32>
    %c0_3 = arith.constant 0 : index
    %c0_4 = arith.constant 0 : index
    %5 = vector.load %arg7[%c0_3, %c0_4] : memref<80x512xf32, #tpu.memory_space<vmem>>, vector<8x512xf32>
    tpu.vector_store %arg7[%c0_3, %c0_4], %4 {strides = array<i32>} : memref<80x512xf32, #tpu.memory_space<vmem>>, vector<8x512xf32>,
    %c16_i32 = arith.constant 16 : i32
    %6 = tpu.dynamic_rotate %0 by %c16_i32 dim 1 : vector<8x512xf32>, i32 -> vector<8x512xf32>
    %c1 = arith.constant 1 : index
    %c0_5 = arith.constant 0 : index
    %7 = vector.load %arg2[%c1, %c0_5] : memref<16x512xf32, #tpu.memory_space<vmem>>, vector<1x512xf32>
    %8 = vector.broadcast %7 : vector<1x512xf32> to vector<8x512xf32>
    %9 = arith.mulf %6, %8 : vector<8x512xf32>
    %c8 = arith.constant 8 : index
    %c0_6 = arith.constant 0 : index
    %10 = vector.load %arg7[%c8, %c0_6] : memref<80x512xf32, #tpu.memory_space<vmem>>, vector<8x512xf32>
    tpu.vector_store %arg7[%c8, %c0_6], %9 {strides = array<i32>} : memref<80x512xf32, #tpu.memory_space<vmem>>, vector<8x512xf32>,
    %c15_i32 = arith.constant 15 : i32
    %11 = tpu.dynamic_rotate %0 by %c15_i32 dim 1 : vector<8x512xf32>, i32 -> vector<8x512xf32>
    %c2 = arith.constant 2 : index
    %c0_7 = arith.constant 0 : index
    %12 = vector.load %arg2[%c2, %c0_7] : memref<16x512xf32, #tpu.memory_space<vmem>>, vector<1x512xf32>
    %13 = vector.broadcast %12 : vector<1x512xf32> to vector<8x512xf32>
    %14 = arith.mulf %11, %13 : vector<8x512xf32>
    %c16 = arith.constant 16 : index
    %c0_8 = arith.constant 0 : index
    %15 = vector.load %arg7[%c16, %c0_8] : memref<80x512xf32, #tpu.memory_space<vmem>>, vector<8x512xf32>
    tpu.vector_store %arg7[%c16, %c0_8], %14 {strides = array<i32>} : memref<80x512xf32, #tpu.memory_space<vmem>>, vector<8x512xf32>,
    %c1_i32 = arith.constant 1 : i32
    %16 = tpu.dynamic_rotate %0 by %c1_i32 dim 1 : vector<8x512xf32>, i32 -> vector<8x512xf32>
    %c3 = arith.constant 3 : index
    %c0_9 = arith.constant 0 : index
    %17 = vector.load %arg2[%c3, %c0_9] : memref<16x512xf32, #tpu.memory_space<vmem>>, vector<1x512xf32>
    %18 = vector.broadcast %17 : vector<1x512xf32> to vector<8x512xf32>
    %19 = arith.mulf %16, %18 : vector<8x512xf32>
    %c24 = arith.constant 24 : index
    %c0_10 = arith.constant 0 : index
    %20 = vector.load %arg7[%c24, %c0_10] : memref<80x512xf32, #tpu.memory_space<vmem>>, vector<8x512xf32>
    tpu.vector_store %arg7[%c24, %c0_10], %19 {strides = array<i32>} : memref<80x512xf32, #tpu.memory_space<vmem>>, vector<8x512xf32>,
    %c32 = arith.constant 32 : index
    %c0_11 = arith.constant 0 : index
    %21 = vector.load %arg7[%c32, %c0_11] : memref<80x512xf32, #tpu.memory_space<vmem>>, vector<8x512xf32>
    tpu.vector_store %arg7[%c32, %c0_11], %0 {strides = array<i32>} : memref<80x512xf32, #tpu.memory_space<vmem>>, vector<8x512xf32>,
    %c511_i32 = arith.constant 511 : i32
    %22 = tpu.dynamic_rotate %0 by %c511_i32 dim 1 : vector<8x512xf32>, i32 -> vector<8x512xf32>
    %c5 = arith.constant 5 : index
    %c0_12 = arith.constant 0 : index
    %23 = vector.load %arg2[%c5, %c0_12] : memref<16x512xf32, #tpu.memory_space<vmem>>, vector<1x512xf32>
    %24 = vector.broadcast %23 : vector<1x512xf32> to vector<8x512xf32>
    %25 = arith.mulf %22, %24 : vector<8x512xf32>
    %c40 = arith.constant 40 : index
    %c0_13 = arith.constant 0 : index
    %26 = vector.load %arg7[%c40, %c0_13] : memref<80x512xf32, #tpu.memory_space<vmem>>, vector<8x512xf32>
    tpu.vector_store %arg7[%c40, %c0_13], %25 {strides = array<i32>} : memref<80x512xf32, #tpu.memory_space<vmem>>, vector<8x512xf32>,
    %c497_i32 = arith.constant 497 : i32
    %27 = tpu.dynamic_rotate %0 by %c497_i32 dim 1 : vector<8x512xf32>, i32 -> vector<8x512xf32>
    %c6 = arith.constant 6 : index
    %c0_14 = arith.constant 0 : index
    %28 = vector.load %arg2[%c6, %c0_14] : memref<16x512xf32, #tpu.memory_space<vmem>>, vector<1x512xf32>
    %29 = vector.broadcast %28 : vector<1x512xf32> to vector<8x512xf32>
    %30 = arith.mulf %27, %29 : vector<8x512xf32>
    %c48 = arith.constant 48 : index
    %c0_15 = arith.constant 0 : index
    %31 = vector.load %arg7[%c48, %c0_15] : memref<80x512xf32, #tpu.memory_space<vmem>>, vector<8x512xf32>
    tpu.vector_store %arg7[%c48, %c0_15], %30 {strides = array<i32>} : memref<80x512xf32, #tpu.memory_space<vmem>>, vector<8x512xf32>,
    %c496_i32 = arith.constant 496 : i32
    %32 = tpu.dynamic_rotate %0 by %c496_i32 dim 1 : vector<8x512xf32>, i32 -> vector<8x512xf32>
    %c7 = arith.constant 7 : index
    %c0_16 = arith.constant 0 : index
    %33 = vector.load %arg2[%c7, %c0_16] : memref<16x512xf32, #tpu.memory_space<vmem>>, vector<1x512xf32>
    %34 = vector.broadcast %33 : vector<1x512xf32> to vector<8x512xf32>
    %35 = arith.mulf %32, %34 : vector<8x512xf32>
    %c56 = arith.constant 56 : index
    %c0_17 = arith.constant 0 : index
    %36 = vector.load %arg7[%c56, %c0_17] : memref<80x512xf32, #tpu.memory_space<vmem>>, vector<8x512xf32>
    tpu.vector_store %arg7[%c56, %c0_17], %35 {strides = array<i32>} : memref<80x512xf32, #tpu.memory_space<vmem>>, vector<8x512xf32>,
    %c495_i32 = arith.constant 495 : i32
    %37 = tpu.dynamic_rotate %0 by %c495_i32 dim 1 : vector<8x512xf32>, i32 -> vector<8x512xf32>
    %c8_18 = arith.constant 8 : index
    %c0_19 = arith.constant 0 : index
    %38 = vector.load %arg2[%c8_18, %c0_19] : memref<16x512xf32, #tpu.memory_space<vmem>>, vector<1x512xf32>
    %39 = vector.broadcast %38 : vector<1x512xf32> to vector<8x512xf32>
    %40 = arith.mulf %37, %39 : vector<8x512xf32>
    %c64 = arith.constant 64 : index
    %c0_20 = arith.constant 0 : index
    %41 = vector.load %arg7[%c64, %c0_20] : memref<80x512xf32, #tpu.memory_space<vmem>>, vector<8x512xf32>
    tpu.vector_store %arg7[%c64, %c0_20], %40 {strides = array<i32>} : memref<80x512xf32, #tpu.memory_space<vmem>>, vector<8x512xf32>,
    %cst = arith.constant 1.000000e+00 : f32
    %42 = vector.broadcast %cst : f32 to vector<8x512xf32>
    %c72 = arith.constant 72 : index
    %c0_21 = arith.constant 0 : index
    %43 = vector.load %arg7[%c72, %c0_21] : memref<80x512xf32, #tpu.memory_space<vmem>>, vector<8x512xf32>
    tpu.vector_store %arg7[%c72, %c0_21], %42 {strides = array<i32>} : memref<80x512xf32, #tpu.memory_space<vmem>>, vector<8x512xf32>,
    %c0_22 = arith.constant 0 : index
    %c0_23 = arith.constant 0 : index
    %44 = vector.load %arg3[%c0_22, %c0_23] : memref<64x80xf32, #tpu.memory_space<vmem>>, vector<64x80xf32>
    %c0_24 = arith.constant 0 : index
    %c0_25 = arith.constant 0 : index
    %45 = vector.load %arg7[%c0_24, %c0_25] : memref<80x512xf32, #tpu.memory_space<vmem>>, vector<80x512xf32>
    %cst_26 = arith.constant dense<0.000000e+00> : vector<64x512xf32>
    %46 = tpu.matmul %44, %45, %cst_26 {dimension_numbers = #tpu.dot_dimension_numbers<[1], [0], [0], [1], [0, 0, 1, 1], [], []>} : vector<64x80xf32>, vector<80x512xf32>, vector<64x512xf32> -> vector<64x512xf32>
    %cst_27 = arith.constant 0.000000e+00 : f32
    %47 = vector.broadcast %cst_27 : f32 to vector<64x512xf32>
    %48 = arith.maximumf %46, %47 : vector<64x512xf32>
    %c0_28 = arith.constant 0 : index
    %c0_29 = arith.constant 0 : index
    %49 = vector.load %arg4[%c0_28, %c0_29] : memref<72x64xf32, #tpu.memory_space<vmem>>, vector<72x64xf32>
    %cst_30 = arith.constant dense<0.000000e+00> : vector<72x512xf32>
    %50 = tpu.matmul %49, %48, %cst_30 {dimension_numbers = #tpu.dot_dimension_numbers<[1], [0], [0], [1], [0, 0, 1, 1], [], []>} : vector<72x64xf32>, vector<64x512xf32>, vector<72x512xf32> -> vector<72x512xf32>
    %51 = vector.extract_strided_slice %50 {offsets = [32, 0], sizes = [8, 512], strides = [1, 1]} : vector<72x512xf32> to vector<8x512xf32>
    %52 = vector.extract_strided_slice %50 {offsets = [0, 0], sizes = [8, 512], strides = [1, 1]} : vector<72x512xf32> to vector<8x512xf32>
    %c17_i32_31 = arith.constant 17 : i32
    %53 = tpu.dynamic_rotate %52 by %c17_i32_31 dim 1 : vector<8x512xf32>, i32 -> vector<8x512xf32>
    %c0_32 = arith.constant 0 : index
    %c0_33 = arith.constant 0 : index
    %54 = vector.load %arg2[%c0_32, %c0_33] : memref<16x512xf32, #tpu.memory_space<vmem>>, vector<1x512xf32>
    %55 = vector.broadcast %54 : vector<1x512xf32> to vector<8x512xf32>
    %56 = arith.mulf %53, %55 : vector<8x512xf32>
    %57 = arith.addf %51, %56 : vector<8x512xf32>
    %58 = vector.extract_strided_slice %50 {offsets = [8, 0], sizes = [8, 512], strides = [1, 1]} : vector<72x512xf32> to vector<8x512xf32>
    %c16_i32_34 = arith.constant 16 : i32
    %59 = tpu.dynamic_rotate %58 by %c16_i32_34 dim 1 : vector<8x512xf32>, i32 -> vector<8x512xf32>
    %c1_35 = arith.constant 1 : index
    %c0_36 = arith.constant 0 : index
    %60 = vector.load %arg2[%c1_35, %c0_36] : memref<16x512xf32, #tpu.memory_space<vmem>>, vector<1x512xf32>
    %61 = vector.broadcast %60 : vector<1x512xf32> to vector<8x512xf32>
    %62 = arith.mulf %59, %61 : vector<8x512xf32>
    %63 = arith.addf %57, %62 : vector<8x512xf32>
    %64 = vector.extract_strided_slice %50 {offsets = [16, 0], sizes = [8, 512], strides = [1, 1]} : vector<72x512xf32> to vector<8x512xf32>
    %c15_i32_37 = arith.constant 15 : i32
    %65 = tpu.dynamic_rotate %64 by %c15_i32_37 dim 1 : vector<8x512xf32>, i32 -> vector<8x512xf32>
    %c2_38 = arith.constant 2 : index
    %c0_39 = arith.constant 0 : index
    %66 = vector.load %arg2[%c2_38, %c0_39] : memref<16x512xf32, #tpu.memory_space<vmem>>, vector<1x512xf32>
    %67 = vector.broadcast %66 : vector<1x512xf32> to vector<8x512xf32>
    %68 = arith.mulf %65, %67 : vector<8x512xf32>
    %69 = arith.addf %63, %68 : vector<8x512xf32>
    %70 = vector.extract_strided_slice %50 {offsets = [24, 0], sizes = [8, 512], strides = [1, 1]} : vector<72x512xf32> to vector<8x512xf32>
    %c1_i32_40 = arith.constant 1 : i32
    %71 = tpu.dynamic_rotate %70 by %c1_i32_40 dim 1 : vector<8x512xf32>, i32 -> vector<8x512xf32>
    %c3_41 = arith.constant 3 : index
    %c0_42 = arith.constant 0 : index
    %72 = vector.load %arg2[%c3_41, %c0_42] : memref<16x512xf32, #tpu.memory_space<vmem>>, vector<1x512xf32>
    %73 = vector.broadcast %72 : vector<1x512xf32> to vector<8x512xf32>
    %74 = arith.mulf %71, %73 : vector<8x512xf32>
    %75 = arith.addf %69, %74 : vector<8x512xf32>
    %76 = vector.extract_strided_slice %50 {offsets = [40, 0], sizes = [8, 512], strides = [1, 1]} : vector<72x512xf32> to vector<8x512xf32>
    %c511_i32_43 = arith.constant 511 : i32
    %77 = tpu.dynamic_rotate %76 by %c511_i32_43 dim 1 : vector<8x512xf32>, i32 -> vector<8x512xf32>
    %c5_44 = arith.constant 5 : index
    %c0_45 = arith.constant 0 : index
    %78 = vector.load %arg2[%c5_44, %c0_45] : memref<16x512xf32, #tpu.memory_space<vmem>>, vector<1x512xf32>
    %79 = vector.broadcast %78 : vector<1x512xf32> to vector<8x512xf32>
    %80 = arith.mulf %77, %79 : vector<8x512xf32>
    %81 = arith.addf %75, %80 : vector<8x512xf32>
    %82 = vector.extract_strided_slice %50 {offsets = [48, 0], sizes = [8, 512], strides = [1, 1]} : vector<72x512xf32> to vector<8x512xf32>
    %c497_i32_46 = arith.constant 497 : i32
    %83 = tpu.dynamic_rotate %82 by %c497_i32_46 dim 1 : vector<8x512xf32>, i32 -> vector<8x512xf32>
    %c6_47 = arith.constant 6 : index
    %c0_48 = arith.constant 0 : index
    %84 = vector.load %arg2[%c6_47, %c0_48] : memref<16x512xf32, #tpu.memory_space<vmem>>, vector<1x512xf32>
    %85 = vector.broadcast %84 : vector<1x512xf32> to vector<8x512xf32>
    %86 = arith.mulf %83, %85 : vector<8x512xf32>
    %87 = arith.addf %81, %86 : vector<8x512xf32>
    %88 = vector.extract_strided_slice %50 {offsets = [56, 0], sizes = [8, 512], strides = [1, 1]} : vector<72x512xf32> to vector<8x512xf32>
    %c496_i32_49 = arith.constant 496 : i32
    %89 = tpu.dynamic_rotate %88 by %c496_i32_49 dim 1 : vector<8x512xf32>, i32 -> vector<8x512xf32>
    %c7_50 = arith.constant 7 : index
    %c0_51 = arith.constant 0 : index
    %90 = vector.load %arg2[%c7_50, %c0_51] : memref<16x512xf32, #tpu.memory_space<vmem>>, vector<1x512xf32>
    %91 = vector.broadcast %90 : vector<1x512xf32> to vector<8x512xf32>
    %92 = arith.mulf %89, %91 : vector<8x512xf32>
    %93 = arith.addf %87, %92 : vector<8x512xf32>
    %94 = vector.extract_strided_slice %50 {offsets = [64, 0], sizes = [8, 512], strides = [1, 1]} : vector<72x512xf32> to vector<8x512xf32>
    %c495_i32_52 = arith.constant 495 : i32
    %95 = tpu.dynamic_rotate %94 by %c495_i32_52 dim 1 : vector<8x512xf32>, i32 -> vector<8x512xf32>
    %c8_53 = arith.constant 8 : index
    %c0_54 = arith.constant 0 : index
    %96 = vector.load %arg2[%c8_53, %c0_54] : memref<16x512xf32, #tpu.memory_space<vmem>>, vector<1x512xf32>
    %97 = vector.broadcast %96 : vector<1x512xf32> to vector<8x512xf32>
    %98 = arith.mulf %95, %97 : vector<8x512xf32>
    %99 = arith.addf %93, %98 : vector<8x512xf32>
    %c0_55 = arith.constant 0 : index
    %c0_56 = arith.constant 0 : index
    %100 = vector.load %arg5[%c0_55, %c0_56] : memref<8x1xf32, #tpu.memory_space<vmem>>, vector<8x1xf32>
    %101 = vector.broadcast %100 : vector<8x1xf32> to vector<8x512xf32>
    %102 = arith.addf %99, %101 : vector<8x512xf32>
    %c0_57 = arith.constant 0 : index
    %c0_58 = arith.constant 0 : index
    %103 = vector.load %arg6[%c0_57, %c0_58] : memref<8x512xf32, #tpu.memory_space<vmem>>, vector<8x512xf32>
    tpu.vector_store %arg6[%c0_57, %c0_58], %102 {strides = array<i32>} : memref<8x512xf32, #tpu.memory_space<vmem>>, vector<8x512xf32>,
    return
  }
  func.func @transform_0(%arg0: i32) -> (i32, i32) {
    %c0_i32 = arith.constant 0 : i32
    %c0_i32_0 = arith.constant 0 : i32
    return %c0_i32, %arg0 : i32, i32
  }
  func.func @transform_1(%arg0: i32) -> (i32, i32) {
    %c0_i32 = arith.constant 0 : i32
    %c0_i32_0 = arith.constant 0 : i32
    return %c0_i32, %arg0 : i32, i32
  }
  func.func @transform_2(%arg0: i32) -> (i32, i32) {
    %c0_i32 = arith.constant 0 : i32
    %c0_i32_0 = arith.constant 0 : i32
    %c0_i32_1 = arith.constant 0 : i32
    return %c0_i32, %c0_i32_0 : i32, i32
  }
  func.func @transform_3(%arg0: i32) -> (i32, i32) {
    %c0_i32 = arith.constant 0 : i32
    %c0_i32_0 = arith.constant 0 : i32
    %c0_i32_1 = arith.constant 0 : i32
    return %c0_i32, %c0_i32_0 : i32, i32
  }
  func.func @transform_4(%arg0: i32) -> (i32, i32) {
    %c0_i32 = arith.constant 0 : i32
    %c0_i32_0 = arith.constant 0 : i32
    %c0_i32_1 = arith.constant 0 : i32
    return %c0_i32, %c0_i32_0 : i32, i32
  }
  func.func @transform_5(%arg0: i32) -> (i32, i32) {
    %c0_i32 = arith.constant 0 : i32
    %c0_i32_0 = arith.constant 0 : i32
    return %c0_i32, %arg0 : i32, i32
  }
}

</mosaic_0001>

<bundles_post_ra>
// kernel: tpu_custom_call.1
= control target key start
LH: loop header
LB: loop body
LE: loop exit
PB: predicated region body
PF: predicated region fallthrough
CT: control target
= control target key end

     0   :  { %10 = vsyncpa [#allocation4], 0  ;;  %s2278_s0 = inlined_call_operand.hbm [shape: f32[8,512], index: 0, kind: input, shape index: {}]   ;;  %s2279_s1 = inlined_call_operand.vmem [shape: f32[16,512], index: 1, kind: input, shape index: {}]   ;;  %s2280_s2 = inlined_call_operand.vmem [shape: f32[64,80], index: 2, kind: input, shape index: {}]   ;;  %s2281_s3 = inlined_call_operand.vmem [shape: f32[72,64], index: 3, kind: input, shape index: {}]   ;;  %s2282_s4 = inlined_call_operand.vmem [shape: f32[8,1], index: 4, kind: input, shape index: {}]   ;;  %s2283_s5 = inlined_call_operand.hbm [shape: f32[8,512], index: 5, kind: output, shape index: {}]  }
   0x1   :  { %11 = vsyncpa [#allocation5], 0  ;;  %s1551_s18 = smov [#allocation3]   ;;  %s1503_s22 = scalar_lea.hbm %s2278_s0, 512 }
   0x2   :  { %s18_s19 = sshll.u32 %s1551_s18, 4  ;;  %p1504_p0 = scmp.ne.s32.totalorder %s2278_s0, %s1503_s22  ;;  %s19_s19 = int_to_ptr.vmem [resolvable:$true] %s18_s19 }
   0x3   :  { %p1507_p1 = scmp.lt.u32.totalorder %s1503_s22, %s2278_s0 }
   0x5   :  { %p1509_p2 = pnand %p1507_p1, %p1504_p0 }
   0x7   :  { %1512 = shalt.err (!%p1509_p2)
}
   0x8   :  { %s1513_s27 = scalar_lea.vmem %s19_s19, 512  ;;  %p1518_p4 = scmp.lt.s32.totalorder %s19_s19, %s19_s19 }
   0x9   :  { %p1514_p3 = scmp.ne.s32.totalorder %s19_s19, %s1513_s27  ;;  %p1519_p5 = scmp.lt.s32.totalorder %s1513_s27, %s1513_s27 }
   0xb   :  { %p1520_p6 = por %p1519_p5, %p1518_p4 }
   0xd   :  { %p1521_p7 = pnand %p1520_p6, %p1514_p3 }
   0xf   :  { %1524 = shalt.err (!%p1521_p7)
}
  0x10   :  { %21 = dma.hbm_to_vmem [thread:$0]  %s2278_s0, 512, %s19_s19, [#allocation4]  }
  0x11   :  { %1547 = dma.done.wait [#allocation4], 512  }
  0x12   :  { %1548 = vsyncadd [#allocation4], 4294966784  ;;  %v1606_v0 = vld [vmem:[#allocation3 + $0x10] sm:$0xff]  ;;  %v1608_v1 = vld [vmem:[#allocation3] sm:$0xff]  ;;  %s1552_s30 = smov 17   ;;  %s1553_s0 = smov 16   ;;  %v45_v5 = vlaneseq }
  0x13   :  { %41 = vrot.lane.b32.xlu1 %v1606_v0, %s1552_s30  ;;  %37 = vrot.lane.b32.xlu0 %v1608_v1, %s1552_s30  ;;  %v1614_v2 = vld [vmem:[#allocation3 + $0x18] sm:$0xff]  ;;  %v1616_v3 = vld [vmem:[#allocation3 + $0x8] sm:$0xff]  ;;  %s1554_s6 = smov 15   ;;  %s1555_s7 = smov 1   ;;  %v1559_v4 = vmov 0.0   ;;  %vm446_vm8 = vcmask 654336  }
  0x14   :  { %s1556_s8 = smov 127   ;;  %s1557_s9 = smov 113   ;;  %535 = vmatprep.mubr.f32.mxu0 %v1559_v4  ;;  %648 = vmatprep.mubr.f32.mxu1 %v1559_v4  ;;  %v55_v6 = vshrl.u32 %v45_v5, 7  ;;  %v1680_v9 = vand.u32 127, %v45_v5  ;;  %vm738_vm9 = vcmask 523264  }
  0x15   :  { %s1558_s10 = smov 112   ;;  %s1560_s11 = smov 111   ;;  %v52_v11 = vld [vmem:[%s2279_s1] ss:$8 sm:$0xf] }
  0x16   :  { %v1682_v10 = vsub.s32 1, %v55_v6  ;;  %v1369_v12 = vld [vmem:[%s2279_s1 + $0x1] ss:$8 sm:$0xf]  ;;  %vm47_vm0 = vcmp.lt.s32.totalorder %v1680_v9, 17  ;;  %v1691_v13 = vsub.s32 0, %v55_v6 }
  0x17   :  { %43 = vrot.lane.b32.xlu1 %v1614_v2, %s1552_s30  ;;  %39 = vrot.lane.b32.xlu0 %v1616_v3, %s1552_s30  ;;  %v1693_v14 = vsub.s32 2, %v55_v6  ;;  %v1695_v15 = vsub.s32 3, %v55_v6  ;;  %vm90_vm1 = vcmp.lt.s32.totalorder %v1680_v9, 16  ;;  %v1370_v52 = vld [vmem:[%s2279_s1 + $0x2] ss:$8 sm:$0xf] }
  0x18   :  { %v61_v18 = vrot.slane %v52_v11, %v1682_v10  ;;  %v105_v19 = vrot.slane %v1369_v12, %v1682_v10  ;;  %v57_v21 = vrot.slane %v52_v11, %v1691_v13  ;;  %v101_v28 = vrot.slane %v1369_v12, %v1691_v13  ;;  %v1371_v53 = vld [vmem:[%s2279_s1 + $0x3] ss:$8 sm:$0xf] }
  0x19   :  { %v65_v22 = vrot.slane %v52_v11, %v1693_v14  ;;  %v69_v25 = vrot.slane %v52_v11, %v1695_v15  ;;  %v109_v29 = vrot.slane %v1369_v12, %v1693_v14  ;;  %v113_v33 = vrot.slane %v1369_v12, %v1695_v15 }
  0x1a   :  { %vm134_vm2 = vcmp.lt.s32.totalorder %v1680_v9, 15  ;;  %v149_v56 = vrot.slane %v1370_v52, %v1682_v10  ;;  %vm178_vm3 = vcmp.lt.s32.totalorder %v1680_v9, 1  ;;  %v193_v57 = vrot.slane %v1371_v53, %v1682_v10 }
  0x1b   :  { %84 = vrot.lane.b32.xlu1 %v1616_v3, %s1553_s0  ;;  %82 = vrot.lane.b32.xlu0 %v1608_v1, %s1553_s0  ;;  %v145_v59 = vrot.slane %v1370_v52, %v1691_v13  ;;  %v153_v60 = vrot.slane %v1370_v52, %v1693_v14  ;;  %v157_v61 = vrot.slane %v1370_v52, %v1695_v15  ;;  %vm226_vm4 = vcmp.lt.s32.totalorder %v1680_v9, 127 }
  0x1c   :  { %vm314_vm5 = vcmp.lt.s32.totalorder %v1680_v9, 112  ;;  %vm270_vm6 = vcmp.lt.s32.totalorder %v1680_v9, 113  ;;  %vm358_vm7 = vcmp.lt.s32.totalorder %v1680_v9, 111 }
  0x1f   :  { %88 = vrot.lane.b32.xlu1 %v1614_v2, %s1553_s0  ;;  %86 = vrot.lane.b32.xlu0 %v1606_v0, %s1553_s0 }
  0x23   :  { %128 = vrot.lane.b32.xlu1 %v1616_v3, %s1554_s6  ;;  %126 = vrot.lane.b32.xlu0 %v1608_v1, %s1554_s6 }
  0x27   :  { %132 = vrot.lane.b32.xlu1 %v1614_v2, %s1554_s6  ;;  %130 = vrot.lane.b32.xlu0 %v1606_v0, %s1554_s6 }
  0x2b   :  { %172 = vrot.lane.b32.xlu1 %v1616_v3, %s1555_s7  ;;  %170 = vrot.lane.b32.xlu0 %v1608_v1, %s1555_s7 }
  0x2f   :  { %176 = vrot.lane.b32.xlu1 %v1614_v2, %s1555_s7  ;;  %174 = vrot.lane.b32.xlu0 %v1606_v0, %s1555_s7 }
  0x33   :  { %220 = vrot.lane.b32.xlu1 %v1616_v3, %s1556_s8  ;;  %218 = vrot.lane.b32.xlu0 %v1608_v1, %s1556_s8 }
  0x37   :  { %224 = vrot.lane.b32.xlu1 %v1614_v2, %s1556_s8  ;;  %222 = vrot.lane.b32.xlu0 %v1606_v0, %s1556_s8 }
  0x3b   :  { %264 = vrot.lane.b32.xlu1 %v1616_v3, %s1557_s9  ;;  %262 = vrot.lane.b32.xlu0 %v1608_v1, %s1557_s9 }
  0x3f   :  { %268 = vrot.lane.b32.xlu1 %v1614_v2, %s1557_s9  ;;  %266 = vrot.lane.b32.xlu0 %v1606_v0, %s1557_s9 }
  0x43   :  { %308 = vrot.lane.b32.xlu1 %v1616_v3, %s1558_s10  ;;  %306 = vrot.lane.b32.xlu0 %v1608_v1, %s1558_s10 }
  0x47   :  { %312 = vrot.lane.b32.xlu1 %v1614_v2, %s1558_s10  ;;  %310 = vrot.lane.b32.xlu0 %v1606_v0, %s1558_s10 }
  0x4b   :  { %352 = vrot.lane.b32.xlu1 %v1616_v3, %s1560_s11  ;;  %350 = vrot.lane.b32.xlu0 %v1608_v1, %s1560_s11 }
  0x4f   :  { %356 = vrot.lane.b32.xlu1 %v1614_v2, %s1560_s11  ;;  %354 = vrot.lane.b32.xlu0 %v1606_v0, %s1560_s11 }
  0x85   :  { %v42_v7 = vpop.permute.xlu1 %41  ;;  %v38_v8 = vpop.permute.xlu0 %37 }
  0x89   :  { %v44_v16 = vpop.permute.xlu1 %43  ;;  %v40_v17 = vpop.permute.xlu0 %39 }
  0x8a   :  { %v50_v20 = vsel %vm47_vm0, %v38_v8, %v40_v17  ;;  %v51_v26 = vsel %vm47_vm0, %v44_v16, %v38_v8  ;;  %v49_v30 = vsel %vm47_vm0, %v40_v17, %v42_v7  ;;  %v48_v34 = vsel %vm47_vm0, %v42_v7, %v44_v16 }
  0x8b   :  { %v75_v31 = vmul.f32 %v61_v18, %v50_v20  ;;  %v74_v35 = vmul.f32 %v57_v21, %v51_v26  ;;  %v76_v39 = vmul.f32 %v65_v22, %v49_v30  ;;  %v77_v45 = vmul.f32 %v69_v25, %v48_v34 }
  0x8c   :  { %v189_v7 = vrot.slane %v1371_v53, %v1691_v13  ;;  %v197_v8 = vrot.slane %v1371_v53, %v1693_v14  ;;  %v201_v17 = vrot.slane %v1371_v53, %v1695_v15 }
  0x8d   :  { %v85_v23 = vpop.permute.xlu1 %84  ;;  %v83_v24 = vpop.permute.xlu0 %82 }
  0x8e   :  { %v93_v27 = vsel %vm90_vm1, %v83_v24, %v85_v23 }
  0x8f   :  { %v119_v32 = vmul.f32 %v105_v19, %v93_v27 }
  0x91   :  { %v89_v36 = vpop.permute.xlu1 %88  ;;  %v87_v37 = vpop.permute.xlu0 %86  ;;  %v1417_v38 = vpack.c.bf16 %v119_v32, %v75_v31  ;;  %v1372_v31 = vld [vmem:[%s2279_s1 + $0x5] ss:$8 sm:$0xf] }
  0x92   :  { %v94_v40 = vsel %vm90_vm1, %v89_v36, %v83_v24  ;;  %v91_v41 = vsel %vm90_vm1, %v87_v37, %v89_v36  ;;  %v92_v42 = vsel %vm90_vm1, %v85_v23, %v87_v37  ;;  %v237_v37 = vrot.slane %v1372_v31, %v1691_v13 }
  0x93   :  { %v118_v43 = vmul.f32 %v101_v28, %v94_v40  ;;  %v120_v44 = vmul.f32 %v109_v29, %v92_v42  ;;  %1418 = vmatprep.subr.bf16.mxu0 %v1417_v38  ;;  %v121_v46 = vmul.f32 %v113_v33, %v91_v41  ;;  %v249_v38 = vrot.slane %v1372_v31, %v1695_v15 }
  0x94   :  { %v241_v40 = vrot.slane %v1372_v31, %v1682_v10  ;;  %v245_v41 = vrot.slane %v1372_v31, %v1693_v14 }
  0x95   :  { %v129_v47 = vpop.permute.xlu1 %128  ;;  %v127_v48 = vpop.permute.xlu0 %126  ;;  %v1419_v49 = vpack.c.bf16 %v118_v43, %v74_v35  ;;  %v1437_v50 = vpack.c.bf16 %v121_v46, %v77_v45  ;;  %v1439_v51 = vpack.c.bf16 %v120_v44, %v76_v39 }
  0x96   :  { %v137_v58 = vsel %vm134_vm2, %v127_v48, %v129_v47 }
  0x97   :  { %1420 = vmatpush1.bf16.msra.mxu0 %v1419_v49  ;;  %1438 = vmatprep.subr.bf16.mxu1 %v1437_v50  ;;  %v163_v11 = vmul.f32 %v149_v56, %v137_v58 }
  0x98   :  { %1440 = vmatpush1.bf16.msra.mxu1 %v1439_v51 }
  0x99   :  { %v133_v54 = vpop.permute.xlu1 %132  ;;  %v131_v55 = vpop.permute.xlu0 %130 }
  0x9a   :  { %v138_v5 = vsel %vm134_vm2, %v133_v54, %v127_v48  ;;  %v136_v12 = vsel %vm134_vm2, %v129_v47, %v131_v55  ;;  %v135_v18 = vsel %vm134_vm2, %v131_v55, %v133_v54 }
  0x9b   :  { %v162_v19 = vmul.f32 %v145_v59, %v138_v5  ;;  %v164_v23 = vmul.f32 %v153_v60, %v136_v12  ;;  %v165_v27 = vmul.f32 %v157_v61, %v135_v18  ;;  %v1374_v59 = vld [vmem:[%s2279_s1 + $0x7] ss:$8 sm:$0xf] }
  0x9c   :  { %v325_v5 = vrot.slane %v1374_v59, %v1691_v13 }
  0x9d   :  { %v173_v62 = vpop.permute.xlu1 %172  ;;  %v171_v63 = vpop.permute.xlu0 %170 }
  0x9e   :  { %v181_v6 = vsel %vm178_vm3, %v171_v63, %v173_v62 }
  0x9f   :  { %v207_v16 = vmul.f32 %v193_v57, %v181_v6 }
  0xa1   :  { %v177_v20 = vpop.permute.xlu1 %176  ;;  %v175_v21 = vpop.permute.xlu0 %174  ;;  %v1421_v22 = vpack.c.bf16 %v207_v16, %v163_v11  ;;  %v333_v11 = vrot.slane %v1374_v59, %v1693_v14 }
  0xa2   :  { %v182_v24 = vsel %vm178_vm3, %v177_v20, %v171_v63  ;;  %v179_v25 = vsel %vm178_vm3, %v175_v21, %v177_v20  ;;  %v180_v26 = vsel %vm178_vm3, %v173_v62, %v175_v21 }
  0xa3   :  { %v206_v28 = vmul.f32 %v189_v7, %v182_v24  ;;  %v208_v29 = vmul.f32 %v197_v8, %v180_v26  ;;  %v209_v30 = vmul.f32 %v201_v17, %v179_v25  ;;  %1422 = vmatprep.subr.bf16.mxu0 %v1421_v22  ;;  %v337_v7 = vrot.slane %v1374_v59, %v1695_v15 }
  0xa4   :  { %v329_v8 = vrot.slane %v1374_v59, %v1682_v10  ;;  %v400_v59 = vld [vmem:[%s2280_s2 + $0x10] sm:$0xff] }
  0xa5   :  { %v221_v32 = vpop.permute.xlu1 %220  ;;  %v219_v33 = vpop.permute.xlu0 %218  ;;  %v1423_v34 = vpack.c.bf16 %v206_v28, %v162_v19  ;;  %v1441_v35 = vpack.c.bf16 %v209_v30, %v165_v27  ;;  %v1443_v36 = vpack.c.bf16 %v208_v29, %v164_v23  ;;  %v1375_v30 = vld [vmem:[%s2279_s1 + $0x20] ss:$8 sm:$0xf] }
  0xa6   :  { %v229_v39 = vsel %vm226_vm4, %v219_v33, %v221_v32 }
  0xa7   :  { %1424 = vmatpush1.bf16.msra.mxu0 %v1423_v34  ;;  %1442 = vmatprep.subr.bf16.mxu1 %v1441_v35  ;;  %v254_v44 = vmul.f32 %v237_v37, %v229_v39  ;;  %v369_v37 = vrot.slane %v1375_v30, %v1691_v13  ;;  %v381_v39 = vrot.slane %v1375_v30, %v1695_v15 }
  0xa8   :  { %1444 = vmatpush1.bf16.msra.mxu1 %v1443_v36 }
  0xa9   :  { %v225_v42 = vpop.permute.xlu1 %224  ;;  %v223_v43 = vpop.permute.xlu0 %222  ;;  %v1427_v56 = vpack.c.bf16 %v254_v44, %v1608_v1 }
  0xaa   :  { %v230_v45 = vsel %vm226_vm4, %v225_v42, %v219_v33  ;;  %v227_v46 = vsel %vm226_vm4, %v223_v43, %v225_v42  ;;  %v228_v47 = vsel %vm226_vm4, %v221_v32, %v223_v43  ;;  %v377_v42 = vrot.slane %v1375_v30, %v1693_v14 }
  0xab   :  { %v257_v48 = vmul.f32 %v249_v38, %v230_v45  ;;  %v255_v49 = vmul.f32 %v241_v40, %v228_v47  ;;  %v256_v50 = vmul.f32 %v245_v41, %v227_v46  ;;  %v373_v41 = vrot.slane %v1375_v30, %v1682_v10 }
  0xad   :  { %v265_v51 = vpop.permute.xlu1 %264  ;;  %v263_v52 = vpop.permute.xlu0 %262  ;;  %v1425_v53 = vpack.c.bf16 %v255_v49, %v1616_v3  ;;  %v1445_v54 = vpack.c.bf16 %v257_v48, %v1614_v2  ;;  %v1447_v55 = vpack.c.bf16 %v256_v50, %v1606_v0  ;;  %v1373_v3 = vld [vmem:[%s2279_s1 + $0x6] ss:$8 sm:$0xf] }
  0xae   :  { %v293_v0 = vrot.slane %v1373_v3, %v1695_v15  ;;  %v285_v1 = vrot.slane %v1373_v3, %v1682_v10  ;;  %v289_v62 = vrot.slane %v1373_v3, %v1693_v14  ;;  %v281_v12 = vrot.slane %v1373_v3, %v1691_v13  ;;  %v401_v3 = vld [vmem:[%s2280_s2 + $0x18] sm:$0xff] }
  0xaf   :  { %1426 = vmatprep.subr.bf16.mxu0 %v1425_v53  ;;  %1446 = vmatprep.subr.bf16.mxu1 %v1445_v54  ;;  %v273_v17 = vsel %vm270_vm6, %v263_v52, %v265_v51 }
  0xb0   :  { %1428 = vmatpush1.bf16.msra.mxu0 %v1427_v56  ;;  %1448 = vmatpush1.bf16.msra.mxu1 %v1447_v55  ;;  %v298_v31 = vmul.f32 %v281_v12, %v273_v17 }
  0xb1   :  { %v269_v57 = vpop.permute.xlu1 %268  ;;  %v267_v58 = vpop.permute.xlu0 %266 }
  0xb2   :  { %v274_v61 = vsel %vm270_vm6, %v269_v57, %v263_v52  ;;  %v272_v63 = vsel %vm270_vm6, %v265_v51, %v267_v58  ;;  %v271_v16 = vsel %vm270_vm6, %v267_v58, %v269_v57  ;;  %v1561_v52 = vmov 1.0   ;;  %v398_v57 = vld [vmem:[%s2280_s2] sm:$0xff]  ;;  %v399_v58 = vld [vmem:[%s2280_s2 + $0x8] sm:$0xff] }
  0xb3   :  { %v301_v18 = vmul.f32 %v293_v0, %v274_v61  ;;  %v299_v19 = vmul.f32 %v285_v1, %v272_v63  ;;  %v300_v26 = vmul.f32 %v289_v62, %v271_v16  ;;  %v402_v0 = vld [vmem:[%s2280_s2 + $0x20] sm:$0xff]  ;;  %v403_v1 = vld [vmem:[%s2280_s2 + $0x28] sm:$0xff]  ;;  %v1562_v62 = vmov 0  }
  0xb4   :  { %v1340_v61 = vld [vmem:[%s2282_s4] sm:$0xff]  ;;  %1502 = vset.pattern.permute.xlu0 %v1562_v62 }
  0xb5   :  { %v309_v2 = vpop.permute.xlu1 %308  ;;  %v307_v60 = vpop.permute.xlu0 %306  ;;  %1343 = vperm.xlu0 %1502, %v1340_v61  }
  0xb6   :  { %v317_v6 = vsel %vm314_vm5, %v307_v60, %v309_v2 }
  0xb7   :  { %v342_v22 = vmul.f32 %v325_v5, %v317_v6 }
  0xb9   :  { %v313_v20 = vpop.permute.xlu1 %312  ;;  %v311_v21 = vpop.permute.xlu0 %310  ;;  %v1431_v38 = vpack.c.bf16 %v342_v22, %v298_v31 }
  0xba   :  { %v318_v23 = vsel %vm314_vm5, %v313_v20, %v307_v60  ;;  %v315_v24 = vsel %vm314_vm5, %v311_v21, %v313_v20  ;;  %v316_v25 = vsel %vm314_vm5, %v309_v2, %v311_v21  ;;  %v404_v2 = vld [vmem:[%s2280_s2 + $0x30] sm:$0xff]  ;;  %v405_v60 = vld [vmem:[%s2280_s2 + $0x38] sm:$0xff] }
  0xbb   :  { %v345_v27 = vmul.f32 %v337_v7, %v318_v23  ;;  %v343_v28 = vmul.f32 %v329_v8, %v316_v25  ;;  %v344_v29 = vmul.f32 %v333_v11, %v315_v24 }
  0xbd   :  { %v353_v32 = vpop.permute.xlu1 %352  ;;  %v351_v33 = vpop.permute.xlu0 %350  ;;  %v1429_v34 = vpack.c.bf16 %v343_v28, %v299_v19  ;;  %v1449_v35 = vpack.c.bf16 %v345_v27, %v301_v18  ;;  %v1451_v36 = vpack.c.bf16 %v344_v29, %v300_v26 }
  0xbe   :  { %v361_v40 = vsel %vm358_vm7, %v351_v33, %v353_v32 }
  0xbf   :  { %1430 = vmatprep.subr.bf16.mxu0 %v1429_v34  ;;  %1450 = vmatprep.subr.bf16.mxu1 %v1449_v35  ;;  %v386_v45 = vmul.f32 %v369_v37, %v361_v40 }
  0xc0   :  { %1432 = vmatpush1.bf16.msra.mxu0 %v1431_v38  ;;  %1452 = vmatpush1.bf16.msra.mxu1 %v1451_v36 }
  0xc1   :  { %v357_v43 = vpop.permute.xlu1 %356  ;;  %v355_v44 = vpop.permute.xlu0 %354  ;;  %v1435_v56 = vpack.c.bf16 %v1561_v52, %v386_v45 }
  0xc2   :  { %v362_v46 = vsel %vm358_vm7, %v357_v43, %v351_v33  ;;  %v359_v47 = vsel %vm358_vm7, %v355_v44, %v357_v43  ;;  %v360_v48 = vsel %vm358_vm7, %v353_v32, %v355_v44 }
  0xc3   :  { %v389_v49 = vmul.f32 %v381_v39, %v362_v46  ;;  %v387_v50 = vmul.f32 %v373_v41, %v360_v48  ;;  %v388_v51 = vmul.f32 %v377_v42, %v359_v47 }
  0xc5   :  { %v1433_v53 = vpack.c.bf16 %v1561_v52, %v387_v50  ;;  %v1453_v54 = vpack.c.bf16 %v1561_v52, %v389_v49  ;;  %v1455_v55 = vpack.c.bf16 %v1561_v52, %v388_v51 }
  0xc7   :  { %1434 = vmatprep.subr.bf16.mxu0 %v1433_v53  ;;  %1454 = vmatprep.subr.bf16.mxu1 %v1453_v54 }
  0xc8   :  { %1436 = vmatpush1.bf16.msra.mxu0 %v1435_v56  ;;  %1456 = vmatpush1.bf16.msra.mxu1 %v1455_v55 }
  0xcb   :  { %1376 = vmatmul.mubr.msk.f32.vlgmr.msra.gmra.mrb[0].mxu0 %vm446_vm8, %v398_v57  ;;  %1384 = vmatmul.mubr.msk.f32.vlgmr.msra.gmra.mrb[0].mxu1 %vm446_vm8, %v398_v57 }
  0xcc   :  { %541 = vmatprep.mubr.f32.mxu0 %v1559_v4  ;;  %654 = vmatprep.mubr.f32.mxu1 %v1559_v4 }
  0xcf   :  { %1377 = vmatmul.mubr.msk.f32.gmra.mrb[2].mxu0 %vm446_vm8, %v399_v58  ;;  %1385 = vmatmul.mubr.msk.f32.gmra.mrb[2].mxu1 %vm446_vm8, %v399_v58 }
  0xd0   :  { %547 = vmatprep.mubr.f32.mxu0 %v1559_v4  ;;  %660 = vmatprep.mubr.f32.mxu1 %v1559_v4 }
  0xd3   :  { %1378 = vmatmul.mubr.msk.f32.gmra.mrb[4].mxu0 %vm446_vm8, %v400_v59  ;;  %1386 = vmatmul.mubr.msk.f32.gmra.mrb[4].mxu1 %vm446_vm8, %v400_v59 }
  0xd4   :  { %553 = vmatprep.mubr.f32.mxu0 %v1559_v4  ;;  %666 = vmatprep.mubr.f32.mxu1 %v1559_v4 }
  0xd7   :  { %1379 = vmatmul.mubr.msk.f32.gmra.mrb[6].mxu0 %vm446_vm8, %v401_v3  ;;  %1387 = vmatmul.mubr.msk.f32.gmra.mrb[6].mxu1 %vm446_vm8, %v401_v3 }
  0xd8   :  { %559 = vmatprep.mubr.f32.mxu0 %v1559_v4  ;;  %672 = vmatprep.mubr.f32.mxu1 %v1559_v4 }
  0xdb   :  { %1380 = vmatmul.mubr.msk.f32.gmra.mrb[8].mxu0 %vm446_vm8, %v402_v0  ;;  %1388 = vmatmul.mubr.msk.f32.gmra.mrb[8].mxu1 %vm446_vm8, %v402_v0 }
  0xdc   :  { %565 = vmatprep.mubr.f32.mxu0 %v1559_v4  ;;  %678 = vmatprep.mubr.f32.mxu1 %v1559_v4 }
  0xdf   :  { %1381 = vmatmul.mubr.msk.f32.gmra.mrb[10].mxu0 %vm446_vm8, %v403_v1  ;;  %1389 = vmatmul.mubr.msk.f32.gmra.mrb[10].mxu1 %vm446_vm8, %v403_v1 }
  0xe0   :  { %571 = vmatprep.mubr.f32.mxu0 %v1559_v4  ;;  %684 = vmatprep.mubr.f32.mxu1 %v1559_v4 }
  0xe3   :  { %1382 = vmatmul.mubr.msk.f32.gmra.mrb[12].mxu0 %vm446_vm8, %v404_v2  ;;  %1390 = vmatmul.mubr.msk.f32.gmra.mrb[12].mxu1 %vm446_vm8, %v404_v2 }
  0xe4   :  { %577 = vmatprep.mubr.f32.mxu0 %v1559_v4  ;;  %690 = vmatprep.mubr.f32.mxu1 %v1559_v4 }
  0xe7   :  { %1383 = vmatmul.mubr.msk.f32.gmra.mrb[14].mxu0 %vm446_vm8, %v405_v60  ;;  %1391 = vmatmul.mubr.msk.f32.gmra.mrb[14].mxu1 %vm446_vm8, %v405_v60 }
  0xe8   :  { %830 = vmatprep.mubr.f32.mxu0 %v1559_v4  ;;  %949 = vmatprep.mubr.f32.mxu1 %v1559_v4 }
 0x19e   :  { %v537_v63 = vpop.f32.mrb[0].mxu0  ;;  %v650_v5 = vpop.f32.mrb[0].mxu1 }
 0x19f   :  { %v539_v6 = vpop.f32.mrb[1].mxu0  ;;  %v652_v7 = vpop.f32.mrb[1].mxu1  ;;  %v699_v8 = vmax.f32 %v650_v5, 0.0  ;;  %v697_v17 = vmax.f32 %v537_v63, 0.0 }
 0x1a0   :  { %v700_v11 = vmax.f32 %v652_v7, 0.0  ;;  %v698_v22 = vmax.f32 %v539_v6, 0.0 }
 0x1a2   :  { %v543_v12 = vpop.f32.mrb[2].mxu0  ;;  %v656_v16 = vpop.f32.mrb[2].mxu1 }
 0x1a3   :  { %v701_v18 = vmax.f32 %v543_v12, 0.0  ;;  %v703_v19 = vmax.f32 %v656_v16, 0.0  ;;  %v545_v20 = vpop.f32.mrb[3].mxu0  ;;  %v658_v21 = vpop.f32.mrb[3].mxu1 }
 0x1a4   :  { %v702_v23 = vmax.f32 %v545_v20, 0.0  ;;  %v704_v24 = vmax.f32 %v658_v21, 0.0 }
 0x1a5   :  { %v1459_v25 = vpack.c.bf16 %v701_v18, %v697_v17  ;;  %v1475_v26 = vpack.c.bf16 %v703_v19, %v699_v8 }
 0x1a6   :  { %v1457_v27 = vpack.c.bf16 %v702_v23, %v698_v22  ;;  %v1473_v28 = vpack.c.bf16 %v704_v24, %v700_v11  ;;  %v549_v29 = vpop.f32.mrb[4].mxu0  ;;  %v662_v30 = vpop.f32.mrb[4].mxu1 }
 0x1a7   :  { %v551_v31 = vpop.f32.mrb[5].mxu0  ;;  %v664_v32 = vpop.f32.mrb[5].mxu1  ;;  %v707_v33 = vmax.f32 %v662_v30, 0.0  ;;  %v705_v37 = vmax.f32 %v549_v29, 0.0 }
 0x1a8   :  { %1458 = vmatprep.subr.bf16.mxu0 %v1457_v27  ;;  %1474 = vmatprep.subr.bf16.mxu1 %v1473_v28  ;;  %v708_v34 = vmax.f32 %v664_v32, 0.0  ;;  %v706_v42 = vmax.f32 %v551_v31, 0.0  ;;  %v729_v31 = vld [vmem:[%s2281_s3] sm:$0xff]  ;;  %v730_v32 = vld [vmem:[%s2281_s3 + $0x8] sm:$0xff] }
 0x1a9   :  { %1460 = vmatpush1.bf16.msra.mxu0 %v1459_v25  ;;  %1476 = vmatpush1.bf16.msra.mxu1 %v1475_v26 }
 0x1aa   :  { %v555_v35 = vpop.f32.mrb[6].mxu0  ;;  %v668_v36 = vpop.f32.mrb[6].mxu1 }
 0x1ab   :  { %v709_v38 = vmax.f32 %v555_v35, 0.0  ;;  %v711_v39 = vmax.f32 %v668_v36, 0.0  ;;  %v557_v40 = vpop.f32.mrb[7].mxu0  ;;  %v670_v41 = vpop.f32.mrb[7].mxu1  ;;  %v733_v35 = vld [vmem:[%s2281_s3 + $0x20] sm:$0xff]  ;;  %v734_v36 = vld [vmem:[%s2281_s3 + $0x28] sm:$0xff] }
 0x1ac   :  { %v710_v43 = vmax.f32 %v557_v40, 0.0  ;;  %v712_v44 = vmax.f32 %v670_v41, 0.0 }
 0x1ad   :  { %v1463_v45 = vpack.c.bf16 %v709_v38, %v705_v37  ;;  %v1479_v46 = vpack.c.bf16 %v711_v39, %v707_v33  ;;  %v731_v33 = vld [vmem:[%s2281_s3 + $0x10] sm:$0xff]  ;;  %v736_v38 = vld [vmem:[%s2281_s3 + $0x38] sm:$0xff]  ;;  %v737_v39 = vld [vmem:[%s2281_s3 + $0x40] sm:$0xff] }
 0x1ae   :  { %v1461_v47 = vpack.c.bf16 %v710_v43, %v706_v42  ;;  %v1477_v48 = vpack.c.bf16 %v712_v44, %v708_v34  ;;  %v561_v49 = vpop.f32.mrb[8].mxu0  ;;  %v674_v50 = vpop.f32.mrb[8].mxu1  ;;  %v732_v34 = vld [vmem:[%s2281_s3 + $0x18] sm:$0xff]  ;;  %v735_v37 = vld [vmem:[%s2281_s3 + $0x30] sm:$0xff] }
 0x1af   :  { %v563_v51 = vpop.f32.mrb[9].mxu0  ;;  %v676_v52 = vpop.f32.mrb[9].mxu1  ;;  %v715_v53 = vmax.f32 %v674_v50, 0.0  ;;  %v713_v57 = vmax.f32 %v561_v49, 0.0 }
 0x1b0   :  { %1462 = vmatprep.subr.bf16.mxu0 %v1461_v47  ;;  %1478 = vmatprep.subr.bf16.mxu1 %v1477_v48  ;;  %v716_v54 = vmax.f32 %v676_v52, 0.0  ;;  %v714_v1 = vmax.f32 %v563_v51, 0.0 }
 0x1b1   :  { %1464 = vmatpush1.bf16.msra.mxu0 %v1463_v45  ;;  %1480 = vmatpush1.bf16.msra.mxu1 %v1479_v46 }
 0x1b2   :  { %v567_v55 = vpop.f32.mrb[10].mxu0  ;;  %v680_v56 = vpop.f32.mrb[10].mxu1 }
 0x1b3   :  { %v717_v58 = vmax.f32 %v567_v55, 0.0  ;;  %v719_v59 = vmax.f32 %v680_v56, 0.0  ;;  %v569_v3 = vpop.f32.mrb[11].mxu0  ;;  %v682_v0 = vpop.f32.mrb[11].mxu1 }
 0x1b4   :  { %v718_v2 = vmax.f32 %v569_v3, 0.0  ;;  %v720_v60 = vmax.f32 %v682_v0, 0.0 }
 0x1b5   :  { %v1467_v61 = vpack.c.bf16 %v717_v58, %v713_v57  ;;  %v1483_v62 = vpack.c.bf16 %v719_v59, %v715_v53 }
 0x1b6   :  { %v1465_v63 = vpack.c.bf16 %v718_v2, %v714_v1  ;;  %v1481_v5 = vpack.c.bf16 %v720_v60, %v716_v54  ;;  %v573_v6 = vpop.f32.mrb[12].mxu0  ;;  %v686_v7 = vpop.f32.mrb[12].mxu1 }
 0x1b7   :  { %v575_v8 = vpop.f32.mrb[13].mxu0  ;;  %v688_v11 = vpop.f32.mrb[13].mxu1  ;;  %v723_v12 = vmax.f32 %v686_v7, 0.0  ;;  %v721_v19 = vmax.f32 %v573_v6, 0.0 }
 0x1b8   :  { %1466 = vmatprep.subr.bf16.mxu0 %v1465_v63  ;;  %1482 = vmatprep.subr.bf16.mxu1 %v1481_v5  ;;  %v724_v16 = vmax.f32 %v688_v11, 0.0  ;;  %v722_v24 = vmax.f32 %v575_v8, 0.0 }
 0x1b9   :  { %1468 = vmatpush1.bf16.msra.mxu0 %v1467_v61  ;;  %1484 = vmatpush1.bf16.msra.mxu1 %v1483_v62 }
 0x1ba   :  { %v579_v17 = vpop.f32.mrb[14].mxu0  ;;  %v692_v18 = vpop.f32.mrb[14].mxu1 }
 0x1bb   :  { %v725_v20 = vmax.f32 %v579_v17, 0.0  ;;  %v727_v21 = vmax.f32 %v692_v18, 0.0  ;;  %v581_v22 = vpop.f32.mrb[15].mxu0  ;;  %v694_v23 = vpop.f32.mrb[15].mxu1 }
 0x1bc   :  { %v726_v25 = vmax.f32 %v581_v22, 0.0  ;;  %v728_v26 = vmax.f32 %v694_v23, 0.0  ;;  %v1982_v17 = vpop.permute.xlu0 %1343 }
 0x1bd   :  { %v1471_v27 = vpack.c.bf16 %v725_v20, %v721_v19  ;;  %v1487_v28 = vpack.c.bf16 %v727_v21, %v723_v12 }
 0x1be   :  { %v1469_v29 = vpack.c.bf16 %v726_v25, %v722_v24  ;;  %v1485_v30 = vpack.c.bf16 %v728_v26, %v724_v16 }
 0x1c0   :  { %1470 = vmatprep.subr.bf16.mxu0 %v1469_v29  ;;  %1486 = vmatprep.subr.bf16.mxu1 %v1485_v30 }
 0x1c1   :  { %1472 = vmatpush1.bf16.msra.mxu0 %v1471_v27  ;;  %1488 = vmatpush1.bf16.msra.mxu1 %v1487_v28 }
 0x1c4   :  { %1392 = vmatmul.mubr.msk.f32.vlgmr.msra.gmra.mrb[16].mxu0 %vm738_vm9, %v729_v31  ;;  %1401 = vmatmul.mubr.msk.f32.vlgmr.msra.gmra.mrb[16].mxu1 %vm738_vm9, %v729_v31 }
 0x1c5   :  { %836 = vmatprep.mubr.f32.mxu0 %v1559_v4  ;;  %955 = vmatprep.mubr.f32.mxu1 %v1559_v4 }
 0x1c8   :  { %1393 = vmatmul.mubr.msk.f32.gmra.mrb[18].mxu0 %vm738_vm9, %v730_v32  ;;  %1402 = vmatmul.mubr.msk.f32.gmra.mrb[18].mxu1 %vm738_vm9, %v730_v32 }
 0x1c9   :  { %842 = vmatprep.mubr.f32.mxu0 %v1559_v4  ;;  %961 = vmatprep.mubr.f32.mxu1 %v1559_v4 }
 0x1cc   :  { %1394 = vmatmul.mubr.msk.f32.gmra.mrb[20].mxu0 %vm738_vm9, %v731_v33  ;;  %1403 = vmatmul.mubr.msk.f32.gmra.mrb[20].mxu1 %vm738_vm9, %v731_v33 }
 0x1cd   :  { %848 = vmatprep.mubr.f32.mxu0 %v1559_v4  ;;  %967 = vmatprep.mubr.f32.mxu1 %v1559_v4 }
 0x1d0   :  { %1395 = vmatmul.mubr.msk.f32.gmra.mrb[22].mxu0 %vm738_vm9, %v732_v34  ;;  %1404 = vmatmul.mubr.msk.f32.gmra.mrb[22].mxu1 %vm738_vm9, %v732_v34  ;;  %v1016_v34 = vld [vmem:[%s2279_s1] ss:$8 sm:$0xf] }
 0x1d1   :  { %854 = vmatprep.mubr.f32.mxu0 %v1559_v4  ;;  %973 = vmatprep.mubr.f32.mxu1 %v1559_v4 }
 0x1d4   :  { %1396 = vmatmul.mubr.msk.f32.gmra.mrb[24].mxu0 %vm738_vm9, %v733_v35  ;;  %1405 = vmatmul.mubr.msk.f32.gmra.mrb[24].mxu1 %vm738_vm9, %v733_v35 }
 0x1d5   :  { %860 = vmatprep.mubr.f32.mxu0 %v1559_v4  ;;  %979 = vmatprep.mubr.f32.mxu1 %v1559_v4 }
 0x1d8   :  { %1397 = vmatmul.mubr.msk.f32.gmra.mrb[26].mxu0 %vm738_vm9, %v734_v36  ;;  %1406 = vmatmul.mubr.msk.f32.gmra.mrb[26].mxu1 %vm738_vm9, %v734_v36  ;;  %v2014_v36 = vld [vmem:[%s2279_s1 + $0x1] ss:$8 sm:$0xf] }
 0x1d9   :  { %866 = vmatprep.mubr.f32.mxu0 %v1559_v4  ;;  %985 = vmatprep.mubr.f32.mxu1 %v1559_v4 }
 0x1dc   :  { %1398 = vmatmul.mubr.msk.f32.gmra.mrb[28].mxu0 %vm738_vm9, %v735_v37  ;;  %1407 = vmatmul.mubr.msk.f32.gmra.mrb[28].mxu1 %vm738_vm9, %v735_v37 }
 0x1dd   :  { %872 = vmatprep.mubr.f32.mxu0 %v1559_v4  ;;  %991 = vmatprep.mubr.f32.mxu1 %v1559_v4 }
 0x1e0   :  { %1399 = vmatmul.mubr.msk.f32.gmra.mrb[30].mxu0 %vm738_vm9, %v736_v38  ;;  %1408 = vmatmul.mubr.msk.f32.gmra.mrb[30].mxu1 %vm738_vm9, %v736_v38  ;;  %v2021_v38 = vld [vmem:[%s2279_s1 + $0x2] ss:$8 sm:$0xf] }
 0x1e1   :  { %878 = vmatprep.mubr.f32.mxu0 %v1559_v4  ;;  %997 = vmatprep.mubr.f32.mxu1 %v1559_v4 }
 0x1e4   :  { %1400 = vmatmul.mubr.msk.f32.gmra.mrb[32].mxu0 %vm738_vm9, %v737_v39  ;;  %1409 = vmatmul.mubr.msk.f32.gmra.mrb[32].mxu1 %vm738_vm9, %v737_v39  ;;  %v1025_v39 = vrot.slane %v1016_v34, %v1682_v10 }
 0x297   :  { %v832_v40 = vpop.f32.mrb[16].mxu0  ;;  %v951_v41 = vpop.f32.mrb[16].mxu1 }
 0x298   :  { %1004 = vrot.lane.b32.xlu0 %v832_v40, %s1552_s30  ;;  %v834_v42 = vpop.f32.mrb[17].mxu0  ;;  %v953_v43 = vpop.f32.mrb[17].mxu1  ;;  %v1029_v40 = vrot.slane %v1016_v34, %v1693_v14 }
 0x299   :  { %1006 = vrot.lane.b32.xlu1 %v834_v42, %s1552_s30  ;;  %v1033_v42 = vrot.slane %v1016_v34, %v1695_v15 }
 0x29b   :  { %v838_v44 = vpop.f32.mrb[18].mxu0  ;;  %v957_v45 = vpop.f32.mrb[18].mxu1 }
 0x29c   :  { %1008 = vrot.lane.b32.xlu0 %v951_v41, %s1552_s30  ;;  %v840_v46 = vpop.f32.mrb[19].mxu0  ;;  %v959_v47 = vpop.f32.mrb[19].mxu1  ;;  %v1021_v41 = vrot.slane %v1016_v34, %v1691_v13 }
 0x29d   :  { %1010 = vrot.lane.b32.xlu1 %v953_v43, %s1552_s30  ;;  %v2030_v43 = vld [vmem:[%s2279_s1 + $0x3] ss:$8 sm:$0xf] }
 0x29f   :  { %v844_v4 = vpop.f32.mrb[20].mxu0  ;;  %v963_v48 = vpop.f32.mrb[20].mxu1 }
 0x2a0   :  { %1046 = vrot.lane.b32.xlu0 %v838_v44, %s1553_s0  ;;  %v846_v49 = vpop.f32.mrb[21].mxu0  ;;  %v965_v50 = vpop.f32.mrb[21].mxu1  ;;  %v1067_v44 = vrot.slane %v2014_v36, %v1682_v10 }
 0x2a1   :  { %1048 = vrot.lane.b32.xlu1 %v840_v46, %s1553_s0  ;;  %v1063_v46 = vrot.slane %v2014_v36, %v1691_v13 }
 0x2a3   :  { %v850_v51 = vpop.f32.mrb[22].mxu0  ;;  %v969_v52 = vpop.f32.mrb[22].mxu1 }
 0x2a4   :  { %1050 = vrot.lane.b32.xlu0 %v957_v45, %s1553_s0  ;;  %v852_v53 = vpop.f32.mrb[23].mxu0  ;;  %v971_v54 = vpop.f32.mrb[23].mxu1  ;;  %v1071_v45 = vrot.slane %v2014_v36, %v1693_v14 }
 0x2a5   :  { %1052 = vrot.lane.b32.xlu1 %v959_v47, %s1553_s0  ;;  %v1075_v47 = vrot.slane %v2014_v36, %v1695_v15 }
 0x2a7   :  { %v1950_v55 = vpop.f32.mrb[24].mxu0  ;;  %v1952_v56 = vpop.f32.mrb[24].mxu1 }
 0x2a8   :  { %1088 = vrot.lane.b32.xlu0 %v844_v4, %s1554_s6  ;;  %v1955_v57 = vpop.f32.mrb[25].mxu0  ;;  %v1957_v58 = vpop.f32.mrb[25].mxu1  ;;  %v2043_v4 = vld [vmem:[%s2279_s1 + $0x5] ss:$8 sm:$0xf] }
 0x2a9   :  { %1090 = vrot.lane.b32.xlu1 %v846_v49, %s1554_s6  ;;  %v1109_v49 = vrot.slane %v2021_v38, %v1682_v10 }
 0x2ab   :  { %v862_v59 = vpop.f32.mrb[26].mxu0  ;;  %v981_v3 = vpop.f32.mrb[26].mxu1 }
 0x2ac   :  { %1092 = vrot.lane.b32.xlu0 %v963_v48, %s1554_s6  ;;  %v864_v0 = vpop.f32.mrb[27].mxu0  ;;  %v983_v1 = vpop.f32.mrb[27].mxu1 }
 0x2ad   :  { %1094 = vrot.lane.b32.xlu1 %v965_v50, %s1554_s6  ;;  %v1113_v50 = vrot.slane %v2021_v38, %v1693_v14 }
 0x2af   :  { %v868_v2 = vpop.f32.mrb[28].mxu0  ;;  %v987_v60 = vpop.f32.mrb[28].mxu1 }
 0x2b0   :  { %1130 = vrot.lane.b32.xlu0 %v850_v51, %s1555_s7  ;;  %v870_v61 = vpop.f32.mrb[29].mxu0  ;;  %v989_v62 = vpop.f32.mrb[29].mxu1  ;;  %v1105_v51 = vrot.slane %v2021_v38, %v1691_v13 }
 0x2b1   :  { %1132 = vrot.lane.b32.xlu1 %v852_v53, %s1555_s7 }
 0x2b3   :  { %v874_v63 = vpop.f32.mrb[30].mxu0  ;;  %v993_v5 = vpop.f32.mrb[30].mxu1 }
 0x2b4   :  { %1134 = vrot.lane.b32.xlu0 %v969_v52, %s1555_s7  ;;  %v876_v6 = vpop.f32.mrb[31].mxu0  ;;  %v995_v7 = vpop.f32.mrb[31].mxu1  ;;  %v1117_v52 = vrot.slane %v2021_v38, %v1695_v15 }
 0x2b5   :  { %1136 = vrot.lane.b32.xlu1 %v971_v54, %s1555_s7  ;;  %v2060_v54 = vld [vmem:[%s2279_s1 + $0x6] ss:$8 sm:$0xf] }
 0x2b7   :  { %v880_v8 = vpop.f32.mrb[32].mxu0  ;;  %v999_v11 = vpop.f32.mrb[32].mxu1 }
 0x2b8   :  { %1172 = vrot.lane.b32.xlu0 %v862_v59, %s1556_s8  ;;  %v882_v12 = vpop.f32.mrb[33].mxu0  ;;  %v1001_v16 = vpop.f32.mrb[33].mxu1  ;;  %v1151_v59 = vrot.slane %v2030_v43, %v1682_v10 }
 0x2b9   :  { %1174 = vrot.lane.b32.xlu1 %v864_v0, %s1556_s8  ;;  %v1147_v0 = vrot.slane %v2030_v43, %v1691_v13 }
 0x2bc   :  { %1176 = vrot.lane.b32.xlu0 %v981_v3, %s1556_s8  ;;  %v1155_v3 = vrot.slane %v2030_v43, %v1693_v14 }
 0x2bd   :  { %1178 = vrot.lane.b32.xlu1 %v983_v1, %s1556_s8  ;;  %v1159_v1 = vrot.slane %v2030_v43, %v1695_v15 }
 0x2c0   :  { %1214 = vrot.lane.b32.xlu0 %v868_v2, %s1557_s9 }
 0x2c1   :  { %1216 = vrot.lane.b32.xlu1 %v870_v61, %s1557_s9  ;;  %v1189_v61 = vrot.slane %v2043_v4, %v1691_v13 }
 0x2c4   :  { %1218 = vrot.lane.b32.xlu0 %v987_v60, %s1557_s9 }
 0x2c5   :  { %1220 = vrot.lane.b32.xlu1 %v989_v62, %s1557_s9  ;;  %v1193_v62 = vrot.slane %v2043_v4, %v1682_v10 }
 0x2c8   :  { %1256 = vrot.lane.b32.xlu0 %v874_v63, %s1558_s10  ;;  %v1197_v63 = vrot.slane %v2043_v4, %v1693_v14 }
 0x2c9   :  { %1258 = vrot.lane.b32.xlu1 %v876_v6, %s1558_s10 }
 0x2cc   :  { %1260 = vrot.lane.b32.xlu0 %v993_v5, %s1558_s10  ;;  %v1201_v5 = vrot.slane %v2043_v4, %v1695_v15 }
 0x2cd   :  { %1262 = vrot.lane.b32.xlu1 %v995_v7, %s1558_s10 }
 0x2d0   :  { %1302 = vrot.lane.b32.xlu0 %v999_v11, %s1560_s11  ;;  %v2091_v11 = vld [vmem:[%s2279_s1 + $0x7] ss:$8 sm:$0xf] }
 0x2d1   :  { %1298 = vrot.lane.b32.xlu1 %v880_v8, %s1560_s11 }
 0x2d5   :  { %1300 = vrot.lane.b32.xlu1 %v882_v12, %s1560_s11 }
 0x2d9   :  { %1304 = vrot.lane.b32.xlu1 %v1001_v16, %s1560_s11 }
 0x30a   :  { %v1005_v18 = vpop.permute.xlu0 %1004 }
 0x30b   :  { %v1007_v19 = vpop.permute.xlu1 %1006 }
 0x30c   :  { %v1014_v2 = vsel %vm47_vm0, %v1005_v18, %v1007_v19 }
 0x30d   :  { %v1039_v38 = vmul.f32 %v1025_v39, %v1014_v2 }
 0x30e   :  { %v1009_v20 = vpop.permute.xlu0 %1008 }
 0x30f   :  { %v1011_v21 = vpop.permute.xlu1 %1010  ;;  %v1013_v12 = vsel %vm47_vm0, %v1007_v19, %v1009_v20 }
 0x310   :  { %v1015_v60 = vsel %vm47_vm0, %v1011_v21, %v1005_v18  ;;  %v1012_v16 = vsel %vm47_vm0, %v1009_v20, %v1011_v21  ;;  %v1040_v2 = vmul.f32 %v1029_v40, %v1013_v12 }
 0x311   :  { %v1038_v8 = vmul.f32 %v1021_v41, %v1015_v60  ;;  %v2118_v41 = vld [vmem:[%s2279_s1 + $0x20] ss:$8 sm:$0xf]  ;;  %v1041_v60 = vmul.f32 %v1033_v42, %v1012_v16  ;;  %s1563_s1 = smov [#allocation6]  }
 0x312   :  { %v1047_v22 = vpop.permute.xlu0 %1046  ;;  %s1360_s13 = sshll.u32 %s1563_s1, 4  ;;  %s1361_s13 = int_to_ptr.vmem [resolvable:$true] %s1360_s13 }
 0x313   :  { %v1984_v23 = vpop.permute.xlu1 %1048  ;;  %v1042_v12 = vadd.f32 %v1038_v8, %v1950_v55  ;;  %v1045_v16 = vadd.f32 %v1041_v60, %v1957_v58  ;;  %s1525_s14 = scalar_lea.vmem %s1361_s13, 512  ;;  %p1530_p9 = scmp.lt.s32.totalorder %s1361_s13, %s1361_s13 }
 0x314   :  { %v1056_v7 = vsel %vm90_vm1, %v1047_v22, %v1984_v23  ;;  %p1526_p8 = scmp.ne.s32.totalorder %s1361_s13, %s1525_s14  ;;  %p1531_p10 = scmp.lt.s32.totalorder %s1525_s14, %s1525_s14 }
 0x315   :  { %v1081_v21 = vmul.f32 %v1067_v44, %v1056_v7 }
 0x316   :  { %v1986_v24 = vpop.permute.xlu0 %1050  ;;  %p1532_p11 = por %p1531_p10, %p1530_p9 }
 0x317   :  { %v1988_v25 = vpop.permute.xlu1 %1052 }
 0x318   :  { %v1057_v19 = vsel %vm90_vm1, %v1988_v25, %v1047_v22  ;;  %v1055_v22 = vsel %vm90_vm1, %v1984_v23, %v1986_v24  ;;  %v1054_v34 = vsel %vm90_vm1, %v1986_v24, %v1988_v25  ;;  %v1043_v23 = vadd.f32 %v1039_v38, %v1955_v57  ;;  %p1533_p12 = pnand %p1532_p11, %p1526_p8 }
 0x319   :  { %v1080_v39 = vmul.f32 %v1063_v46, %v1057_v19  ;;  %v1315_v24 = vrot.slane %v2118_v41, %v1691_v13  ;;  %v1319_v25 = vrot.slane %v2118_v41, %v1682_v10  ;;  %v1082_v44 = vmul.f32 %v1071_v45, %v1055_v22 }
 0x31a   :  { %v1990_v26 = vpop.permute.xlu0 %1088  ;;  %v1083_v46 = vmul.f32 %v1075_v47, %v1054_v34  ;;  %v1085_v34 = vadd.f32 %v1081_v21, %v1043_v23 }
 0x31b   :  { %v1992_v27 = vpop.permute.xlu1 %1090  ;;  %v1084_v38 = vadd.f32 %v1080_v39, %v1042_v12  ;;  %v2285_v12 = vrot.slane %v2060_v54, %v1682_v10 }
 0x31c   :  { %v1098_v20 = vsel %vm134_vm2, %v1990_v26, %v1992_v27 }
 0x31e   :  { %v1994_v28 = vpop.permute.xlu0 %1092 }
 0x31f   :  { %v1996_v29 = vpop.permute.xlu1 %1094  ;;  %v1097_v7 = vsel %vm134_vm2, %v1992_v27, %v1994_v28  ;;  %v1044_v27 = vadd.f32 %v1040_v2, %v1952_v56 }
 0x320   :  { %v1099_v40 = vsel %vm134_vm2, %v1996_v29, %v1990_v26  ;;  %v1096_v57 = vsel %vm134_vm2, %v1994_v28, %v1996_v29  ;;  %v1123_v26 = vmul.f32 %v1109_v49, %v1098_v20  ;;  %v1124_v29 = vmul.f32 %v1113_v50, %v1097_v7 }
 0x321   :  { %v1122_v55 = vmul.f32 %v1105_v51, %v1099_v40  ;;  %v1125_v49 = vmul.f32 %v1117_v52, %v1096_v57  ;;  %v1086_v50 = vadd.f32 %v1082_v44, %v1044_v27  ;;  %v1087_v52 = vadd.f32 %v1083_v46, %v1045_v16 }
 0x322   :  { %v1998_v30 = vpop.permute.xlu0 %1130 }
 0x323   :  { %v2000_v31 = vpop.permute.xlu1 %1132  ;;  %v1126_v21 = vadd.f32 %v1122_v55, %v1084_v38  ;;  %v1128_v2 = vadd.f32 %v1124_v29, %v1086_v50  ;;  %v1129_v60 = vadd.f32 %v1125_v49, %v1087_v52  ;;  %v2286_v55 = vrot.slane %v2091_v11, %v1691_v13 }
 0x324   :  { %v1140_v8 = vsel %vm178_vm3, %v1998_v30, %v2000_v31  ;;  %v2289_v38 = vrot.slane %v2060_v54, %v1695_v15  ;;  %v1323_v29 = vrot.slane %v2118_v41, %v1693_v14  ;;  %v1327_v49 = vrot.slane %v2118_v41, %v1695_v15 }
 0x325   :  { %v1165_v19 = vmul.f32 %v1151_v59, %v1140_v8  ;;  %v2291_v50 = vrot.slane %v2091_v11, %v1695_v15 }
 0x326   :  { %v2002_v32 = vpop.permute.xlu0 %1134 }
 0x327   :  { %v2004_v33 = vpop.permute.xlu1 %1136  ;;  %v1139_v51 = vsel %vm178_vm3, %v2000_v31, %v2002_v32  ;;  %v1127_v31 = vadd.f32 %v1123_v26, %v1085_v34 }
 0x328   :  { %v1141_v45 = vsel %vm178_vm3, %v2004_v33, %v1998_v30  ;;  %v1138_v30 = vsel %vm178_vm3, %v2002_v32, %v2004_v33  ;;  %v1166_v32 = vmul.f32 %v1155_v3, %v1139_v51 }
 0x329   :  { %v1164_v20 = vmul.f32 %v1147_v0, %v1141_v45  ;;  %v1167_v33 = vmul.f32 %v1159_v1, %v1138_v30  ;;  %v2287_v45 = vrot.slane %v2091_v11, %v1682_v10 }
 0x32a   :  { %v2009_v35 = vpop.permute.xlu0 %1172  ;;  %v1170_v46 = vadd.f32 %v1166_v32, %v1128_v2 }
 0x32b   :  { %v2016_v37 = vpop.permute.xlu1 %1174  ;;  %v1171_v7 = vadd.f32 %v1167_v33, %v1129_v60 }
 0x32c   :  { %v1182_v56 = vsel %vm226_vm4, %v2009_v35, %v2016_v37 }
 0x32d   :  { %v1206_v3 = vmul.f32 %v1189_v61, %v1182_v56  ;;  %v2290_v56 = vrot.slane %v2091_v11, %v1693_v14 }
 0x32e   :  { %v2045_v48 = vpop.permute.xlu0 %1176 }
 0x32f   :  { %v2055_v53 = vpop.permute.xlu1 %1178  ;;  %v1181_v58 = vsel %vm226_vm4, %v2016_v37, %v2045_v48 }
 0x330   :  { %v1180_v59 = vsel %vm226_vm4, %v2045_v48, %v2055_v53  ;;  %v1183_v37 = vsel %vm226_vm4, %v2055_v53, %v2009_v35  ;;  %v1207_v43 = vmul.f32 %v1193_v62, %v1181_v58  ;;  %v1169_v35 = vadd.f32 %v1165_v19, %v1127_v31 }
 0x331   :  { %v1168_v53 = vadd.f32 %v1164_v20, %v1126_v21  ;;  %v1208_v22 = vmul.f32 %v1197_v63, %v1180_v59  ;;  %v1209_v61 = vmul.f32 %v1201_v5, %v1183_v37 }
 0x332   :  { %v2082_v6 = vpop.permute.xlu0 %1214  ;;  %v1211_v26 = vadd.f32 %v1207_v43, %v1169_v35 }
 0x333   :  { %v1217_v18 = vpop.permute.xlu1 %1216  ;;  %v1210_v57 = vadd.f32 %v1206_v3, %v1168_v53  ;;  %v1212_v51 = vadd.f32 %v1208_v22, %v1170_v46  ;;  %v1213_v30 = vadd.f32 %v1209_v61, %v1171_v7 }
 0x334   :  { %v1224_v1 = vsel %vm270_vm6, %v2082_v6, %v1217_v18 }
 0x336   :  { %v1219_v36 = vpop.permute.xlu0 %1218 }
 0x337   :  { %v1221_v42 = vpop.permute.xlu1 %1220  ;;  %v1223_v48 = vsel %vm270_vm6, %v1217_v18, %v1219_v36  ;;  %v2284_v18 = vrot.slane %v2060_v54, %v1691_v13 }
 0x338   :  { %v1249_v44 = vmul.f32 %v2285_v12, %v1223_v48  ;;  %v1222_v63 = vsel %vm270_vm6, %v1219_v36, %v1221_v42  ;;  %v1225_v4 = vsel %vm270_vm6, %v1221_v42, %v2082_v6  ;;  %v2288_v42 = vrot.slane %v2060_v54, %v1693_v14 }
 0x339   :  { %v1248_v23 = vmul.f32 %v2284_v18, %v1224_v1 }
 0x33a   :  { %v1257_v47 = vpop.permute.xlu0 %1256  ;;  %v1250_v34 = vmul.f32 %v2288_v42, %v1222_v63  ;;  %v1253_v20 = vadd.f32 %v1249_v44, %v1211_v26 }
 0x33b   :  { %v1259_v28 = vpop.permute.xlu1 %1258  ;;  %v1252_v19 = vadd.f32 %v1248_v23, %v1210_v57 }
 0x33c   :  { %v1266_v62 = vsel %vm314_vm5, %v1257_v47, %v1259_v28  ;;  %v1254_v59 = vadd.f32 %v1250_v34, %v1212_v51 }
 0x33d   :  { %v1290_v8 = vmul.f32 %v2286_v55, %v1266_v62 }
 0x33e   :  { %v1261_v0 = vpop.permute.xlu0 %1260 }
 0x33f   :  { %v1263_v39 = vpop.permute.xlu1 %1262  ;;  %v1265_v40 = vsel %vm314_vm5, %v1259_v28, %v1261_v0  ;;  %v1251_v28 = vmul.f32 %v2289_v38, %v1225_v4  ;;  %v1294_v21 = vadd.f32 %v1290_v8, %v1252_v19 }
 0x340   :  { %v1291_v27 = vmul.f32 %v2287_v45, %v1265_v40  ;;  %v1264_v36 = vsel %vm314_vm5, %v1261_v0, %v1263_v39  ;;  %v1267_v16 = vsel %vm314_vm5, %v1263_v39, %v1257_v47 }
 0x341   :  { %v1292_v58 = vmul.f32 %v2290_v56, %v1264_v36  ;;  %v1293_v54 = vmul.f32 %v2291_v50, %v1267_v16  ;;  %v1255_v37 = vadd.f32 %v1251_v28, %v1213_v30 }
 0x342   :  { %v1303_v6 = vpop.permute.xlu0 %1302  ;;  %v1295_v32 = vadd.f32 %v1291_v27, %v1253_v20 }
 0x343   :  { %v1299_v5 = vpop.permute.xlu1 %1298  ;;  %v1296_v39 = vadd.f32 %v1292_v58, %v1254_v59  ;;  %v1297_v3 = vadd.f32 %v1293_v54, %v1255_v37 }
 0x347   :  { %v1301_v47 = vpop.permute.xlu1 %1300 }
 0x348   :  { %v1308_v52 = vsel %vm358_vm7, %v1299_v5, %v1301_v47  ;;  %v1307_v31 = vsel %vm358_vm7, %v1301_v47, %v1303_v6 }
 0x349   :  { %v1332_v33 = vmul.f32 %v1315_v24, %v1308_v52  ;;  %v1333_v14 = vmul.f32 %v1319_v25, %v1307_v31 }
 0x34b   :  { %v1336_v15 = vadd.f32 %v1332_v33, %v1294_v21  ;;  %v1337_v11 = vadd.f32 %v1333_v14, %v1295_v32  ;;  %v1305_v0 = vpop.permute.xlu1 %1304 }
 0x34c   :  { %v1306_v43 = vsel %vm358_vm7, %v1303_v6, %v1305_v0  ;;  %v1309_v1 = vsel %vm358_vm7, %v1305_v0, %v1299_v5 }
 0x34d   :  { %v1346_v13 = vadd.f32 %v1982_v17, %v1336_v15  ;;  %v1347_v24 = vadd.f32 %v1982_v17, %v1337_v11  ;;  %v1334_v48 = vmul.f32 %v1323_v29, %v1306_v43  ;;  %v1335_v10 = vmul.f32 %v1327_v49, %v1309_v1 }
 0x34f   :  { %1350 = vst [vmem:[#allocation6] sm:$0xff] %v1346_v13  ;;  %1351 = vst [vmem:[#allocation6 + $0x8] sm:$0xff] %v1347_v24  ;;  %v1338_v41 = vadd.f32 %v1334_v48, %v1296_v39  ;;  %v1339_v25 = vadd.f32 %v1335_v10, %v1297_v3 }
 0x351   :  { %v1348_v2 = vadd.f32 %v1982_v17, %v1338_v41  ;;  %v1349_v60 = vadd.f32 %v1982_v17, %v1339_v25 }
 0x353   :  { %1352 = vst [vmem:[#allocation6 + $0x10] sm:$0xff] %v1348_v2  ;;  %1353 = vst [vmem:[#allocation6 + $0x18] sm:$0xff] %v1349_v60 }
 0x354   :  { %1536 = shalt.err (!%p1533_p12)
}
 0x355   :  { %s1537_s17 = scalar_lea.hbm %s2283_s5, 512 }
 0x356   :  { %p1538_p13 = scmp.ne.s32.totalorder %s2283_s5, %s1537_s17  ;;  %p1541_p0 = scmp.lt.u32.totalorder %s1537_s17, %s2283_s5 }
 0x358   :  { %p1543_p1 = pnand %p1541_p0, %p1538_p13 }
 0x35a   :  { %1546 = shalt.err (!%p1543_p1)
}
 0x35b   :  { %1363 = dma.vmem_to_hbm [thread:$0]  %s1361_s13, 512, %s2283_s5, [#allocation5]  }
 0x35c   :  { %1549 = dma.done.wait [#allocation5], 512  }
 0x35d   :  { %1550 = vsyncadd [#allocation5], 4294966784 }
 0x35e   :  { %1367 = vsyncpa [#allocation4], 1 }
 0x35f   :  { %1368 = vsyncpa [#allocation5], 1 }

</bundles_post_ra>
